<compile_context>
chip_gen: v6e
topology: v6e:2x2x1
jax: 0.10.0
libtpu: 0.0.40
codegen_flags: <defaults>
</compile_context>

<pallas_src>
import functools

import jax
import jax.numpy as jnp
from jax.experimental import pallas as pl
from jax.experimental.pallas import tpu as pltpu


def _patch_embed_kernel(x_ref, w_ref, pos_ref, cls_ref, o_ref):
    # x_ref  : (KB, N, D_in)  patches for KB batch elements (this M tile)
    # w_ref  : (D_in, E)      projection weight, grid-invariant
    # pos_ref: (N, E)         position[1:] + linear bias, grid-invariant
    # cls_ref: (1, E)         cls_token + position[0], grid-invariant
    # o_ref  : (KB, N+1, E)   tokens: row 0 = cls, rows 1..N = patches
    kb, n, _ = x_ref.shape
    w = w_ref[...]
    pos = pos_ref[...]
    cls_row = cls_ref[...]
    # Static unrolled loop over the KB batch elements of this tile; each dot
    # is an (N, D_in) x (D_in, E) MXU matmul with f32 accumulation.
    for j in range(kb):
        acc = jnp.dot(x_ref[j], w, preferred_element_type=jnp.float32)
        o_ref[j, pl.ds(0, 1), :] = cls_row.astype(o_ref.dtype)
        o_ref[j, pl.ds(1, n), :] = (acc + pos).astype(o_ref.dtype)


def _pick_batch_tile(b, n, d_in, emb, x_itemsize, w_itemsize, out_itemsize,
                     *, target_rows=1024, budget_bytes=36 << 20):
    """Pick KB = batch elements per grid step and a matching VMEM limit.

    Targets up to `target_rows` patch rows per step (HBM-roofline sweet spot
    is ~512-1024 rows), keeps >= 2 grid steps when B >= 2 (so the "parallel"
    batch axis can be sharded across TensorCores), and respects a VMEM
    budget that is safe on v7x (64 MiB physical) as well as v5e/v6e.
    """
    def vmem_bytes(kb):
        # Conservative: assume every operand is double-buffered (the
        # grid-invariant weight/pos/cls could be single-buffered with
        # pl.Buffered(1); we budget 2x instead of relying on it).
        return (2 * kb * n * d_in * x_itemsize              # x tile
                + 2 * kb * (n + 1) * emb * out_itemsize     # out tile
                + 2 * d_in * emb * w_itemsize               # weight
                + 2 * (n + 2) * emb * 4)                    # pos + cls

    best = 1
    for kb in range(1, b + 1):
        if b % kb:
            continue
        if kb * n > target_rows:
            continue
        if b >= 2 and b // kb < 2:
            continue                       # keep >= 2 parallel grid steps
        if vmem_bytes(kb) > budget_bytes:
            continue
        best = kb
    limit = int(min(48 << 20, max(32 << 20, vmem_bytes(best) + (8 << 20))))
    return best, limit


@functools.partial(
    jax.jit,
    static_argnames=("patch_size", "use_bf16", "out_dtype", "target_rows"))
def patch_embedding(x_nchw, weight, bias, cls_token, position, *,
                    patch_size, use_bf16=False, out_dtype=jnp.float32,
                    target_rows=1024):
    """x_nchw: (B, C, H, W). weight: (C*P*P, E) in (h1, w1, c) row order
    (i.e. torch nn.Linear weight transposed). Returns (B, N+1, E)."""
    b, c, h, w = x_nchw.shape
    ph, pw = h // patch_size, w // patch_size
    n = ph * pw
    d_in = c * patch_size * patch_size
    emb = weight.shape[1]
    assert position.shape == (n + 1, emb)

    # --- XLA glue: patchify.  Column order (c, h1, w1) keeps the minormost
    # dim (w1) in place across the transpose; weight rows are permuted to
    # match, so the result is identical to einops' (h1, w1, c) order.
    xp = x_nchw.reshape(b, c, ph, patch_size, pw, patch_size)
    xp = jnp.transpose(xp, (0, 2, 4, 1, 3, 5))          # (b, ph, pw, c, h1, w1)
    x3d = xp.reshape(b, n, d_in)

    w_r = weight.reshape(patch_size, patch_size, c, emb)   # rows were (h1,w1,c)
    w_r = jnp.transpose(w_r, (2, 0, 1, 3)).reshape(d_in, emb)  # -> (c,h1,w1)

    # Fold the linear bias into the patch-row positions and the cls token
    # into a single grid-invariant row.
    pos_patch = (position[1:] + bias[None, :]).astype(jnp.float32)   # (N, E)
    cls_row = (cls_token.reshape(1, emb) + position[0:1]).astype(jnp.float32)

    if use_bf16:
        # Cast once in the wrapper (fuses into the rearrange): halves the
        # dominant activation/weight HBM streams.  Accumulation stays f32.
        x3d = x3d.astype(jnp.bfloat16)
        w_r = w_r.astype(jnp.bfloat16)

    kb, vmem_limit = _pick_batch_tile(
        b, n, d_in, emb,
        x_itemsize=x3d.dtype.itemsize,
        w_itemsize=w_r.dtype.itemsize,
        out_itemsize=jnp.dtype(out_dtype).itemsize,
        target_rows=target_rows)

    out = pl.pallas_call(
        _patch_embed_kernel,
        out_shape=jax.ShapeDtypeStruct((b, n + 1, emb), out_dtype),
        grid_spec=pltpu.PrefetchScalarGridSpec(
            num_scalar_prefetch=0,
            grid=(b // kb,),
            in_specs=[
                pl.BlockSpec((kb, n, d_in), lambda i: (i, 0, 0)),   # patches
                pl.BlockSpec((d_in, emb), lambda i: (0, 0)),        # weight
                pl.BlockSpec((n, emb), lambda i: (0, 0)),           # pos + bias
                pl.BlockSpec((1, emb), lambda i: (0, 0)),           # cls row
            ],
            out_specs=pl.BlockSpec((kb, n + 1, emb), lambda i: (i, 0, 0)),
        ),
        compiler_params=pltpu.CompilerParams(
            dimension_semantics=("parallel",),
            vmem_limit_bytes=vmem_limit),
    )(x3d, w_r, pos_patch, cls_row)
    return out


if __name__ == "__main__":
    # Small shapes consistent with the module:
    #   batch=2, in_channels=4, img_size=16, patch_size=4, emb_size=32
    B, C, IMG, P, E = 2, 4, 16, 4, 32
    N = (IMG // P) ** 2           # 16 patches
    D_IN = C * P * P              # 64

    key = jax.random.PRNGKey(0)
    kx, kw, kb_, kc, kp = jax.random.split(key, 5)

    x = jax.random.normal(kx, (B, C, IMG, IMG), dtype=jnp.float32)
    # nn.Linear(in, out): torch weight is (out, in); store transposed (in, out)
    # with rows in einops' (h1, w1, c) order, exactly like the PyTorch module.
    weight = jax.random.normal(kw, (D_IN, E), dtype=jnp.float32) * 0.02
    bias = jax.random.normal(kb_, (E,), dtype=jnp.float32) * 0.02
    cls_token = jax.random.normal(kc, (1, 1, E), dtype=jnp.float32)
    position = jax.random.normal(kp, (N + 1, E), dtype=jnp.float32)

    out = patch_embedding(x, weight, bias, cls_token, position, patch_size=P)
    out = jax.block_until_ready(out)

    # Pure-JAX reference (mirrors the PyTorch module / einops ordering).
    xp = x.reshape(B, C, IMG // P, P, IMG // P, P)
    xp = jnp.transpose(xp, (0, 2, 4, 3, 5, 1)).reshape(B, N, D_IN)
    proj = xp @ weight + bias
    cls = jnp.broadcast_to(cls_token, (B, 1, E))
    ref = jnp.concatenate([cls, proj], axis=1) + position[None]

    assert out.shape == (B, N + 1, E)
    assert jnp.allclose(out, ref, atol=2e-4, rtol=2e-4)

    print("KERNEL_OK")
</pallas_src>

<mosaic_0001>
module attributes {stable_mosaic.version = 11 : i64} {
  func.func @_patch_embed_kernel(%arg0: i32, %arg1: memref<1x16x64xf32, #tpu.memory_space<vmem>>, %arg2: memref<64x32xf32, #tpu.memory_space<vmem>>, %arg3: memref<16x32xf32, #tpu.memory_space<vmem>>, %arg4: memref<1x32xf32, #tpu.memory_space<vmem>>, %arg5: memref<1x17x32xf32, #tpu.memory_space<vmem>>) attributes {dimension_semantics = [#tpu.dimension_semantics<parallel>], iteration_bounds = array<i64: 2>, scalar_prefetch = 0 : i64, scratch_operands = 0 : i64, tpu.core_type = #tpu.core_type<tc>, window_params = [{transform_indices = @transform_0, window_bounds = array<i64: 1, 16, 64>}, {pipeline_mode = #tpu.pipeline_mode<synchronous>, transform_indices = @transform_1, window_bounds = array<i64: 64, 32>}, {pipeline_mode = #tpu.pipeline_mode<synchronous>, transform_indices = @transform_2, window_bounds = array<i64: 16, 32>}, {pipeline_mode = #tpu.pipeline_mode<synchronous>, transform_indices = @transform_3, window_bounds = array<i64: 1, 32>}, {transform_indices = @transform_4, window_bounds = array<i64: 1, 17, 32>}]} {
    %c0 = arith.constant 0 : index
    %c0_0 = arith.constant 0 : index
    %0 = vector.load %arg2[%c0, %c0_0] : memref<64x32xf32, #tpu.memory_space<vmem>>, vector<64x32xf32>
    %c0_1 = arith.constant 0 : index
    %c0_2 = arith.constant 0 : index
    %1 = vector.load %arg3[%c0_1, %c0_2] : memref<16x32xf32, #tpu.memory_space<vmem>>, vector<16x32xf32>
    %c0_3 = arith.constant 0 : index
    %c0_4 = arith.constant 0 : index
    %2 = vector.load %arg4[%c0_3, %c0_4] : memref<1x32xf32, #tpu.memory_space<vmem>>, vector<1x32xf32>
    %c0_5 = arith.constant 0 : index
    %c0_6 = arith.constant 0 : index
    %c0_7 = arith.constant 0 : index
    %3 = vector.load %arg1[%c0_5, %c0_6, %c0_7] : memref<1x16x64xf32, #tpu.memory_space<vmem>>, vector<1x16x64xf32>
    %4 = vector.shape_cast %3 : vector<1x16x64xf32> to vector<16x64xf32>
    %cst = arith.constant dense<0.000000e+00> : vector<16x32xf32>
    %5 = tpu.matmul %4, %0, %cst {dimension_numbers = #tpu.dot_dimension_numbers<[1], [0], [0], [1], [0, 0, 1, 1], [], []>} : vector<16x64xf32>, vector<64x32xf32>, vector<16x32xf32> -> vector<16x32xf32>
    %c0_8 = arith.constant 0 : index
    %c0_9 = arith.constant 0 : index
    %c0_10 = arith.constant 0 : index
    %6 = vector.load %arg5[%c0_8, %c0_9, %c0_10] : memref<1x17x32xf32, #tpu.memory_space<vmem>>, vector<1x1x32xf32>
    %7 = vector.shape_cast %6 : vector<1x1x32xf32> to vector<1x32xf32>
    %8 = vector.shape_cast %2 : vector<1x32xf32> to vector<1x1x32xf32>
    tpu.vector_store %arg5[%c0_8, %c0_9, %c0_10], %8 {strides = array<i32>} : memref<1x17x32xf32, #tpu.memory_space<vmem>>, vector<1x1x32xf32>,
    %9 = arith.addf %5, %1 : vector<16x32xf32>
    %c0_11 = arith.constant 0 : index
    %c1 = arith.constant 1 : index
    %c0_12 = arith.constant 0 : index
    %10 = vector.load %arg5[%c0_11, %c1, %c0_12] : memref<1x17x32xf32, #tpu.memory_space<vmem>>, vector<1x16x32xf32>
    %11 = vector.shape_cast %10 : vector<1x16x32xf32> to vector<16x32xf32>
    %12 = vector.shape_cast %9 : vector<16x32xf32> to vector<1x16x32xf32>
    tpu.vector_store %arg5[%c0_11, %c1, %c0_12], %12 {strides = array<i32>} : memref<1x17x32xf32, #tpu.memory_space<vmem>>, vector<1x16x32xf32>,
    return
  }
  func.func @transform_0(%arg0: i32) -> (i32, i32, i32) {
    %c0_i32 = arith.constant 0 : i32
    %c0_i32_0 = arith.constant 0 : i32
    %c0_i32_1 = arith.constant 0 : i32
    return %arg0, %c0_i32, %c0_i32_0 : i32, i32, i32
  }
  func.func @transform_1(%arg0: i32) -> (i32, i32) {
    %c0_i32 = arith.constant 0 : i32
    %c0_i32_0 = arith.constant 0 : i32
    %c0_i32_1 = arith.constant 0 : i32
    return %c0_i32, %c0_i32_0 : i32, i32
  }
  func.func @transform_2(%arg0: i32) -> (i32, i32) {
    %c0_i32 = arith.constant 0 : i32
    %c0_i32_0 = arith.constant 0 : i32
    %c0_i32_1 = arith.constant 0 : i32
    return %c0_i32, %c0_i32_0 : i32, i32
  }
  func.func @transform_3(%arg0: i32) -> (i32, i32) {
    %c0_i32 = arith.constant 0 : i32
    %c0_i32_0 = arith.constant 0 : i32
    %c0_i32_1 = arith.constant 0 : i32
    return %c0_i32, %c0_i32_0 : i32, i32
  }
  func.func @transform_4(%arg0: i32) -> (i32, i32, i32) {
    %c0_i32 = arith.constant 0 : i32
    %c0_i32_0 = arith.constant 0 : i32
    %c0_i32_1 = arith.constant 0 : i32
    return %arg0, %c0_i32, %c0_i32_0 : i32, i32, i32
  }
}

</mosaic_0001>

<bundles_post_ra>
// kernel: patch_embedding.1
= control target key start
LH: loop header
LB: loop body
LE: loop exit
PB: predicated region body
PF: predicated region fallthrough
CT: control target
= control target key end

     0   :  { %s437_s15 = smov 0   ;;  %s489_s0 = inlined_call_operand.vmem [shape: f32[2,16,64], index: 0, kind: input, shape index: {}]   ;;  %s490_s1 = inlined_call_operand.vmem [shape: f32[64,32], index: 1, kind: input, shape index: {}]   ;;  %s491_s2 = inlined_call_operand.vmem [shape: f32[16,32], index: 2, kind: input, shape index: {}]   ;;  %s492_s3 = inlined_call_operand.vmem [shape: f32[1,32], index: 3, kind: input, shape index: {}]   ;;  %s493_s4 = inlined_call_operand.vmem [shape: f32[2,17,32], index: 4, kind: output, shape index: {}]  }
   0x1 LB: > { %s353_s16 = sadd.s32 4294967295, %s410_s15   ;;  %p357_p0 = scmp.ge.s32.totalorder %s410_s15, 1  ;;  %s410_s15 = sphi %s437_s15, %s14_s15  }
   0x2   : > { %p162_p1 = scmp.lt.s32.totalorder %s410_s15, 3 }
   0x4   : > { %p163_p2 = pnand %p357_p0, %p162_p1 }
   0x5   : > { %p188_p3 = scmp.lt.s32.totalorder (!%p163_p2), %s353_s16, 1 }
   0x6   : > { %166 = sbr.rel (%p163_p2) target bundleno = 226 (0xe2), region = 36 }
   0xb   : > { %v205_v0 = vld [vmem:[%s490_s1 + $0x38] sm:$0xff]  ;;  %v204_v1 = vld [vmem:[%s490_s1 + $0x30] sm:$0xff]  ;;  %v203_v2 = vld [vmem:[%s490_s1 + $0x28] sm:$0xff]  ;;  %s495_s16 = smov (!%p188_p3, %s353_s16), 1  ;;  %vm211_vm0 = vcmask 253952   ;;  %vm213_vm1 = vcmask 523264  }
   0xc   : > { %376 = vmatprep.subr.mxu0 %v205_v0  ;;  %v202_v3 = vld [vmem:[%s490_s1 + $0x20] sm:$0xff]  ;;  %s365_s25 = sshll.u32 %s495_s16, 4  ;;  %s395_s26 = smul.u32 24, %s495_s16  ;;  %v201_v5 = vld [vmem:[%s490_s1 + $0x18] sm:$0xff]  ;;  %v200_v7 = vld [vmem:[%s490_s1 + $0x10] sm:$0xff]  ;;  %vm295_vm2 = vcmask 261120  }
   0xd   : > { %377 = vmatpush3.msra.mxu0 %v205_v0  ;;  %v208_v4 = vld [vmem:[%s492_s3] sm:$0x1]  ;;  %s192_s5 = scalar_lea.vmem %s489_s0, %s365_s25  ;;  %v199_v8 = vld [vmem:[%s490_s1 + $0x8] sm:$0xff] }
   0xe   : > { %378 = vmatprep.subr.mxu0 %v204_v1  ;;  %s197_s10 = scalar_lea.vmem %s493_s4, %s395_s26  ;;  %v209_v6 = vld [vmem:[%s192_s5] sm:$0xff]  ;;  %v210_v10 = vld [vmem:[%s192_s5 + $0x8] sm:$0xff] }
   0xf   : > { %379 = vmatpush3.msra.mxu0 %v204_v1  ;;  %212 = vst.msk [vmem:[%s197_s10] sm:$0x1] %vm211_vm0, %v208_v4  ;;  %392 = vmatprep.mubr.msk.f32.mxu0 %vm213_vm1, %v209_v6  ;;  %v198_v9 = vld [vmem:[%s490_s1] sm:$0xff]  ;;  %v207_v11 = vld [vmem:[%s491_s2 + $0x8] sm:$0xff] }
  0x10   : > { %380 = vmatprep.subr.mxu0 %v203_v2  ;;  %v206_v13 = vld [vmem:[%s491_s2] sm:$0xff] }
  0x11   : > { %381 = vmatpush3.msra.mxu0 %v203_v2 }
  0x12   : > { %382 = vmatprep.subr.mxu0 %v202_v3 }
  0x13   : > { %383 = vmatpush3.msra.mxu0 %v202_v3 }
  0x14   : > { %384 = vmatprep.subr.mxu0 %v201_v5 }
  0x15   : > { %385 = vmatpush3.msra.mxu0 %v201_v5 }
  0x16   : > { %386 = vmatprep.subr.mxu0 %v200_v7 }
  0x17   : > { %387 = vmatpush3.msra.mxu0 %v200_v7 }
  0x18   : > { %388 = vmatprep.subr.mxu0 %v199_v8 }
  0x19   : > { %389 = vmatpush3.msra.mxu0 %v199_v8 }
  0x1a   : > { %390 = vmatprep.subr.mxu0 %v198_v9 }
  0x1b   : > { %391 = vmatpush3.msra.mxu0 %v198_v9 }
  0x1c   : > { %393 = vmatmul.mubr.msk.f32.vlgmr.msra.gmra.mxu0 %vm213_vm1, %v210_v10 }
  0xdc   : > { %v394_v12 = vpop.f32.mrf.mxu0 }
  0xdd   : > { %v292_v14 = vadd.f32 %v394_v12, %v207_v11 }
  0xde   : > { %v286_v15 = vpop.f32.mrf.mxu0 }
  0xdf   : > { %297 = vst.msk [vmem:[%s197_s10 + $0x9] sm:$0xff] %vm295_vm2, %v292_v14  ;;  %v287_v16 = vadd.f32 %v286_v15, %v206_v13 }
  0xe1   : > { %296 = vst.msk [vmem:[%s197_s10 + $0x1] sm:$0xff] %vm295_vm2, %v287_v16 }
  0xe2 PF: > { %s14_s15 = sadd.s32 1, %s410_s15  }
  0xe3   : > { %p11_p4 = scmp.ge.s32.totalorder %s14_s15, 4  }
  0xe5   :  { %13 = sbr.rel (!%p11_p4) target bundleno = 1 (0x1), region = 66 }

</bundles_post_ra>
